<compile_context>
chip_gen: v5e
topology: v5e:2x2
jax: 0.10.0
libtpu: 0.0.40
codegen_flags: <defaults>
</compile_context>

<pallas_src>
import jax
import jax.numpy as jnp
from jax import lax
from jax.experimental import pallas as pl
from jax.experimental.pallas import tpu as pltpu

_MAX_TILE_B = 8192  # multiple of 128; per-tile VMEM stays a few MiB at most


def _round_up(x, m):
    return ((x + m - 1) // m) * m


def _choose_tile_b(batch):
    """Pick a batch tile: whole batch when small, else >=2 tiles of 128-multiples."""
    if batch <= 256:
        return batch                     # single full-extent block (layout-legal)
    n_steps = max(2, pl.cdiv(batch, _MAX_TILE_B))   # >=2 steps for v7x's 2 TCs
    return min(_MAX_TILE_B, _round_up(pl.cdiv(batch, n_steps), 128))


def mlp_critic_kernel(x_ref, w1_ref, b1_ref, w2_ref, b2_ref, w3t_ref, b3_ref,
                      out_ref):
    # obs streamed as f32; cast to bf16 at the MXU boundary (VPU cast, hidden
    # under the BlockSpec pipeline -- no separate wrapper pass over obs).
    x = x_ref[...].astype(jnp.bfloat16)

    # Hidden layer 1: bf16 MXU matmul, f32 accumulation; bias + tanh in f32.
    h1 = jnp.tanh(
        jnp.dot(x, w1_ref[...], preferred_element_type=jnp.float32)
        + b1_ref[...])

    # Hidden layer 2 (cast activations to bf16 only at the MXU boundary).
    h2 = jnp.tanh(
        jnp.dot(h1.astype(jnp.bfloat16), w2_ref[...],
                preferred_element_type=jnp.float32)
        + b2_ref[...])

    # Output head (out_features == 1): contract the feature axis of h2 against
    # the w3 row, producing (1, tile_b) directly -- batch lands on the lane
    # axis so the store is a dense, unmasked vst.  Explicit dot_general with
    # contracting dims ((1,),(1,)) keeps this a transposed-RHS MXU matmul
    # (bf16 operands, f32 acc) with no materialized (tile_b, H2) transpose.
    v_row = lax.dot_general(
        w3t_ref[...], h2.astype(jnp.bfloat16),
        dimension_numbers=(((1,), (1,)), ((), ())),
        preferred_element_type=jnp.float32)            # (1, tile_b)

    # Ragged final tile: padded obs rows hold unspecified (finite) data; tanh
    # keeps them finite and the partial output block is masked on writeback,
    # so padding never reaches HBM.  (Keep this in mind if the head ever uses
    # log/exp on raw inputs.)
    out_ref[...] = (v_row + b3_ref[...]).astype(out_ref.dtype)


def mlp_critic_forward(obs, params):
    """obs: [B, obs_dim] float32.  Returns value estimates of shape [B]."""
    w1, b1, w2, b2, w3, b3 = params
    B, obs_dim = obs.shape
    h1_dim = w1.shape[1]
    h2_dim = w2.shape[1]

    # Weights (batch-invariant, cast once) go to the MXU in bf16; biases f32.
    w1_bf16 = w1.astype(jnp.bfloat16)
    w2_bf16 = w2.astype(jnp.bfloat16)
    w3t_bf16 = w3.reshape(1, h2_dim).astype(jnp.bfloat16)   # head as (1, H2) row
    b3_2d = b3.reshape(1, 1).astype(jnp.float32)

    tile_b = _choose_tile_b(B)
    grid = (pl.cdiv(B, tile_b),)

    # Weights/biases: constant index_map -> DMA'd once, VMEM-resident.
    def resident(shape):
        return pl.BlockSpec(shape, lambda i: (0, 0))

    out = pl.pallas_call(
        mlp_critic_kernel,
        out_shape=jax.ShapeDtypeStruct((1, B), jnp.float32),
        grid=grid,
        in_specs=[
            pl.BlockSpec((tile_b, obs_dim), lambda i: (i, 0)),   # streamed f32 obs
            resident((obs_dim, h1_dim)),                         # w1 (bf16)
            resident((1, h1_dim)),                               # b1 (f32)
            resident((h1_dim, h2_dim)),                          # w2 (bf16)
            resident((1, h2_dim)),                               # b2 (f32)
            resident((1, h2_dim)),                               # w3^T (bf16)
            resident((1, 1)),                                    # b3 (f32)
        ],
        out_specs=pl.BlockSpec((1, tile_b), lambda i: (0, i)),   # lane-dense
        compiler_params=pltpu.CompilerParams(
            dimension_semantics=("parallel",)),
    )(obs, w1_bf16, b1, w2_bf16, b2, w3t_bf16, b3_2d)

    # torch.squeeze(..., -1): kernel already produced a lane-dense value row.
    return out.reshape(B)


def init_params(key, obs_dim, hidden_sizes):
    """Deterministic synthetic init of the v_net parameters.

    Weight shapes follow nn.Linear(in, out) but stored transposed as
    [in, out]; biases stored as [1, out] for clean broadcasting in-kernel.
    """
    sizes = [obs_dim] + list(hidden_sizes) + [1]
    params = []
    for j in range(len(sizes) - 1):
        fan_in, fan_out = sizes[j], sizes[j + 1]
        key, kw, kb = jax.random.split(key, 3)
        bound = 1.0 / jnp.sqrt(jnp.float32(fan_in))
        w = jax.random.uniform(kw, (fan_in, fan_out), jnp.float32,
                               minval=-bound, maxval=bound)
        b = jax.random.uniform(kb, (1, fan_out), jnp.float32,
                               minval=-bound, maxval=bound)
        params += [w, b]
    return tuple(params)


def mlp_critic_reference(obs, params):
    """Pure-JAX reference using the identical bf16-operand / f32-accum recipe."""
    w1, b1, w2, b2, w3, b3 = params
    x = obs.astype(jnp.bfloat16)
    h1 = jnp.tanh(jnp.dot(x, w1.astype(jnp.bfloat16),
                          preferred_element_type=jnp.float32) + b1)
    h2 = jnp.tanh(jnp.dot(h1.astype(jnp.bfloat16), w2.astype(jnp.bfloat16),
                          preferred_element_type=jnp.float32) + b2)
    v = jnp.dot(h2.astype(jnp.bfloat16), w3.astype(jnp.bfloat16),
                preferred_element_type=jnp.float32) + b3
    return v[:, 0]


if __name__ == "__main__":
    obs_dim = 16
    hidden_sizes = (64, 64)   # activation = Tanh
    batch = 8

    key = jax.random.PRNGKey(0)
    key, k_obs = jax.random.split(key)
    obs = jax.random.normal(k_obs, (batch, obs_dim), jnp.float32)
    params = init_params(key, obs_dim, hidden_sizes)

    v = jax.block_until_ready(mlp_critic_forward(obs, params))
    v_ref = mlp_critic_reference(obs, params)
    assert v.shape == (batch,), v.shape
    assert jnp.allclose(v, v_ref, atol=2e-3, rtol=2e-3), (v, v_ref)

    # Also exercise the batch grid: >= 2 tiles (v7x both-TC path) plus a
    # ragged final tile.
    key, k_big = jax.random.split(key)
    big_batch = 1000
    obs_big = jax.random.normal(k_big, (big_batch, obs_dim), jnp.float32)
    v_big = jax.block_until_ready(mlp_critic_forward(obs_big, params))
    v_big_ref = mlp_critic_reference(obs_big, params)
    assert v_big.shape == (big_batch,), v_big.shape
    assert jnp.allclose(v_big, v_big_ref, atol=2e-3, rtol=2e-3)

    print("KERNEL_OK")
</pallas_src>

<mosaic_0001>
module attributes {stable_mosaic.version = 11 : i64} {
  func.func @mlp_critic_kernel(%arg0: i32, %arg1: memref<8x16xf32, #tpu.memory_space<vmem>>, %arg2: memref<16x64xbf16, #tpu.memory_space<vmem>>, %arg3: memref<1x64xf32, #tpu.memory_space<vmem>>, %arg4: memref<64x64xbf16, #tpu.memory_space<vmem>>, %arg5: memref<1x64xf32, #tpu.memory_space<vmem>>, %arg6: memref<1x64xbf16, #tpu.memory_space<vmem>>, %arg7: memref<1x1xf32, #tpu.memory_space<vmem>>, %arg8: memref<1x8xf32, #tpu.memory_space<vmem>>) attributes {dimension_semantics = [#tpu.dimension_semantics<parallel>], iteration_bounds = array<i64: 1>, scalar_prefetch = 0 : i64, scratch_operands = 0 : i64, tpu.core_type = #tpu.core_type<tc>, window_params = [{transform_indices = @transform_0, window_bounds = array<i64: 8, 16>}, {pipeline_mode = #tpu.pipeline_mode<synchronous>, transform_indices = @transform_1, window_bounds = array<i64: 16, 64>}, {pipeline_mode = #tpu.pipeline_mode<synchronous>, transform_indices = @transform_2, window_bounds = array<i64: 1, 64>}, {pipeline_mode = #tpu.pipeline_mode<synchronous>, transform_indices = @transform_3, window_bounds = array<i64: 64, 64>}, {pipeline_mode = #tpu.pipeline_mode<synchronous>, transform_indices = @transform_4, window_bounds = array<i64: 1, 64>}, {pipeline_mode = #tpu.pipeline_mode<synchronous>, transform_indices = @transform_5, window_bounds = array<i64: 1, 64>}, {pipeline_mode = #tpu.pipeline_mode<synchronous>, transform_indices = @transform_6, window_bounds = array<i64: 1, 1>}, {transform_indices = @transform_7, window_bounds = array<i64: 1, 8>}]} {
    %c0 = arith.constant 0 : index
    %c0_0 = arith.constant 0 : index
    %0 = vector.load %arg1[%c0, %c0_0] : memref<8x16xf32, #tpu.memory_space<vmem>>, vector<8x16xf32>
    %1 = arith.truncf %0 : vector<8x16xf32> to vector<8x16xbf16>
    %c0_1 = arith.constant 0 : index
    %c0_2 = arith.constant 0 : index
    %2 = vector.load %arg2[%c0_1, %c0_2] : memref<16x64xbf16, #tpu.memory_space<vmem>>, vector<16x64xbf16>
    %cst = arith.constant dense<0.000000e+00> : vector<8x64xf32>
    %3 = tpu.matmul %1, %2, %cst {dimension_numbers = #tpu.dot_dimension_numbers<[1], [0], [0], [1], [0, 0, 1, 1], [], []>} : vector<8x16xbf16>, vector<16x64xbf16>, vector<8x64xf32> -> vector<8x64xf32>
    %c0_3 = arith.constant 0 : index
    %c0_4 = arith.constant 0 : index
    %4 = vector.load %arg3[%c0_3, %c0_4] : memref<1x64xf32, #tpu.memory_space<vmem>>, vector<1x64xf32>
    %5 = vector.broadcast %4 : vector<1x64xf32> to vector<8x64xf32>
    %6 = arith.addf %3, %5 : vector<8x64xf32>
    %7 = math.tanh %6 : vector<8x64xf32>
    %8 = arith.truncf %7 : vector<8x64xf32> to vector<8x64xbf16>
    %c0_5 = arith.constant 0 : index
    %c0_6 = arith.constant 0 : index
    %9 = vector.load %arg4[%c0_5, %c0_6] : memref<64x64xbf16, #tpu.memory_space<vmem>>, vector<64x64xbf16>
    %cst_7 = arith.constant dense<0.000000e+00> : vector<8x64xf32>
    %10 = tpu.matmul %8, %9, %cst_7 {dimension_numbers = #tpu.dot_dimension_numbers<[1], [0], [0], [1], [0, 0, 1, 1], [], []>} : vector<8x64xbf16>, vector<64x64xbf16>, vector<8x64xf32> -> vector<8x64xf32>
    %c0_8 = arith.constant 0 : index
    %c0_9 = arith.constant 0 : index
    %11 = vector.load %arg5[%c0_8, %c0_9] : memref<1x64xf32, #tpu.memory_space<vmem>>, vector<1x64xf32>
    %12 = vector.broadcast %11 : vector<1x64xf32> to vector<8x64xf32>
    %13 = arith.addf %10, %12 : vector<8x64xf32>
    %14 = math.tanh %13 : vector<8x64xf32>
    %c0_10 = arith.constant 0 : index
    %c0_11 = arith.constant 0 : index
    %15 = vector.load %arg6[%c0_10, %c0_11] : memref<1x64xbf16, #tpu.memory_space<vmem>>, vector<1x64xbf16>
    %16 = arith.truncf %14 : vector<8x64xf32> to vector<8x64xbf16>
    %cst_12 = arith.constant dense<0.000000e+00> : vector<1x8xf32>
    %17 = tpu.matmul %15, %16, %cst_12 {dimension_numbers = #tpu.dot_dimension_numbers<[1], [1], [0], [0], [0, 0, 1, 0], [], []>} : vector<1x64xbf16>, vector<8x64xbf16>, vector<1x8xf32> -> vector<1x8xf32>
    %c0_13 = arith.constant 0 : index
    %c0_14 = arith.constant 0 : index
    %18 = vector.load %arg7[%c0_13, %c0_14] : memref<1x1xf32, #tpu.memory_space<vmem>>, vector<1x1xf32>
    %19 = vector.broadcast %18 : vector<1x1xf32> to vector<1x8xf32>
    %20 = arith.addf %17, %19 : vector<1x8xf32>
    %c0_15 = arith.constant 0 : index
    %c0_16 = arith.constant 0 : index
    %21 = vector.load %arg8[%c0_15, %c0_16] : memref<1x8xf32, #tpu.memory_space<vmem>>, vector<1x8xf32>
    tpu.vector_store %arg8[%c0_15, %c0_16], %20 {strides = array<i32>} : memref<1x8xf32, #tpu.memory_space<vmem>>, vector<1x8xf32>,
    return
  }
  func.func @transform_0(%arg0: i32) -> (i32, i32) {
    %c0_i32 = arith.constant 0 : i32
    %c0_i32_0 = arith.constant 0 : i32
    return %arg0, %c0_i32 : i32, i32
  }
  func.func @transform_1(%arg0: i32) -> (i32, i32) {
    %c0_i32 = arith.constant 0 : i32
    %c0_i32_0 = arith.constant 0 : i32
    %c0_i32_1 = arith.constant 0 : i32
    return %c0_i32, %c0_i32_0 : i32, i32
  }
  func.func @transform_2(%arg0: i32) -> (i32, i32) {
    %c0_i32 = arith.constant 0 : i32
    %c0_i32_0 = arith.constant 0 : i32
    %c0_i32_1 = arith.constant 0 : i32
    return %c0_i32, %c0_i32_0 : i32, i32
  }
  func.func @transform_3(%arg0: i32) -> (i32, i32) {
    %c0_i32 = arith.constant 0 : i32
    %c0_i32_0 = arith.constant 0 : i32
    %c0_i32_1 = arith.constant 0 : i32
    return %c0_i32, %c0_i32_0 : i32, i32
  }
  func.func @transform_4(%arg0: i32) -> (i32, i32) {
    %c0_i32 = arith.constant 0 : i32
    %c0_i32_0 = arith.constant 0 : i32
    %c0_i32_1 = arith.constant 0 : i32
    return %c0_i32, %c0_i32_0 : i32, i32
  }
  func.func @transform_5(%arg0: i32) -> (i32, i32) {
    %c0_i32 = arith.constant 0 : i32
    %c0_i32_0 = arith.constant 0 : i32
    %c0_i32_1 = arith.constant 0 : i32
    return %c0_i32, %c0_i32_0 : i32, i32
  }
  func.func @transform_6(%arg0: i32) -> (i32, i32) {
    %c0_i32 = arith.constant 0 : i32
    %c0_i32_0 = arith.constant 0 : i32
    %c0_i32_1 = arith.constant 0 : i32
    return %c0_i32, %c0_i32_0 : i32, i32
  }
  func.func @transform_7(%arg0: i32) -> (i32, i32) {
    %c0_i32 = arith.constant 0 : i32
    %c0_i32_0 = arith.constant 0 : i32
    return %c0_i32, %arg0 : i32, i32
  }
}

</mosaic_0001>

<bundles_post_ra>
// kernel: tpu_custom_call.1
= control target key start
LH: loop header
LB: loop body
LE: loop exit
PB: predicated region body
PF: predicated region fallthrough
CT: control target
= control target key end

     0   :  { %s428_s0 = inlined_call_operand.hbm [shape: f32[8,16], index: 0, kind: input, shape index: {}]   ;;  %s429_s1 = inlined_call_operand.hbm [shape: bf16[16,64], index: 1, kind: input, shape index: {}]   ;;  %s430_s2 = inlined_call_operand.vmem [shape: f32[1,64], index: 2, kind: input, shape index: {}]   ;;  %s431_s3 = inlined_call_operand.hbm [shape: bf16[64,64], index: 3, kind: input, shape index: {}]   ;;  %s432_s4 = inlined_call_operand.vmem [shape: f32[1,64], index: 4, kind: input, shape index: {}]   ;;  %s433_s5 = inlined_call_operand.vmem [shape: bf16[1,64], index: 5, kind: input, shape index: {}]   ;;  %s434_s6 = inlined_call_operand.<no memory space> [shape: f32[1,1], index: 6, kind: input, shape index: {}]   ;;  %s435_s7 = inlined_call_operand.hbm [shape: f32[1,8], index: 7, kind: output, shape index: {}]  }
   0x1   :  { %v12_v0 = vstv %s434_s6 }
   0x2   :  { %13 = vst [vmem:[#allocation2] sm:$0x1] %v12_v0 }
   0x3   :  { %14 = vsyncpa [#allocation4], 0 }
   0x4   :  { %15 = vsyncpa [#allocation7], 0  ;;  %s32_s28 = sshll.u32 %s429_s1, 4  ;;  %s33_s28 = int_to_ptr.hbm [resolvable:$true] %s32_s28 }
   0x5   :  { %16 = vsyncpa [#allocation5], 0  ;;  %s354_s29 = smov [#allocation6]   ;;  %s22_s10 = sshll.u32 %s428_s0, 4  ;;  %s23_s10 = int_to_ptr.hbm [resolvable:$true] %s22_s10 }
   0x6   :  { %s34_s30 = sshll.u32 %s354_s29, 4  ;;  %s355_s11 = smov 64   ;;  %s35_s30 = int_to_ptr.vmem [resolvable:$true] %s34_s30 }
   0x7   :  { %s356_s12 = smov 4   ;;  %s357_s6 = smov [#allocation3]  }
   0x8   :  { %40 = dma.hbm_to_vmem [thread:$0]  %s33_s28, 128, %s35_s30, [#allocation7], %s355_s11, %s355_s11, %s356_s12  }
   0x9   :  { %s24_s13 = sshll.u32 %s357_s6, 4  ;;  %s47_s16 = sshll.u32 %s431_s3, 4  ;;  %s25_s13 = int_to_ptr.vmem [resolvable:$true] %s24_s13  ;;  %s48_s16 = int_to_ptr.hbm [resolvable:$true] %s47_s16 }
   0xa   :  { %27 = dma.hbm_to_vmem [thread:$0]  %s23_s10, 128, %s25_s13, [#allocation4]  }
   0xb   :  { %s358_s1 = smov [#allocation8]  }
   0xc   :  { %s49_s17 = sshll.u32 %s358_s1, 4  ;;  %s50_s17 = int_to_ptr.vmem [resolvable:$true] %s49_s17 }
   0xd   :  { %55 = dma.hbm_to_vmem [thread:$0]  %s48_s16, 512, %s50_s17, [#allocation7], %s355_s11, %s355_s11, %s356_s12  }
   0xe   :  { %348 = dma.done.wait [#allocation4], 128  }
   0xf   :  { %349 = vsyncadd [#allocation4], 4294967168 }
  0x10   :  { %350 = dma.done.wait [#allocation7], 640  }
  0x11   :  { %351 = vsyncadd [#allocation7], 4294966656  ;;  %v233_v1 = vld [vmem:[#allocation6] sm:$0xff]  ;;  %v75_v2 = vld [vmem:[#allocation3] sm:$0xff]  ;;  %vm89_vm0 = vcmask 130048   ;;  %vm144_vm1 = vcmask 523264  }
  0x12   :  { %v237_v3 = vld [vmem:[#allocation8 + $0x18] sm:$0xff]  ;;  %v76_v4 = vpack.c.bf16 %v75_v2, %v75_v2  ;;  %100 = vmatpush.bf16.msra.mxu0 %v233_v1  ;;  %v236_v5 = vld [vmem:[#allocation8 + $0x10] sm:$0xff]  ;;  %v235_v6 = vld [vmem:[#allocation8 + $0x8] sm:$0xff]  ;;  %v359_v15 = vmov 0   ;;  %s360_s21 = smov [#allocation9]   ;;  %s199_s24 = sshll.u32 %s435_s7, 4  ;;  %s200_s24 = int_to_ptr.hbm [resolvable:$true] %s199_s24 }
  0x13   :  { %152 = vmatpush.bf16.msra.mxu1 %v237_v3  ;;  %v234_v7 = vld [vmem:[#allocation8] sm:$0xff]  ;;  %v246_v8 = vld [vmem:[%s430_s2] ss:$0 sm:$0xff]  ;;  %245 = vset.pattern.permute.xlu0 %v359_v15  ;;  %s197_s22 = sshll.u32 %s360_s21, 4  ;;  %vm190_vm2 = vcmask 57344   ;;  %s198_s22 = int_to_ptr.vmem [resolvable:$true] %s197_s22 }
  0x14   :  { %v164_v14 = vld [vmem:[#allocation2] sm:$0x1] }
  0x15   :  { %214 = vmatmul.msk.bf16.vlgmr.msra.gmra.mxu0 %vm89_vm0, %v76_v4  ;;  %167 = vperm.xlu0 %245, %v164_v14   ;;  %v247_v16 = vld [vmem:[%s432_s4] ss:$0 sm:$0xff] }
  0x16   :  { %v162_v23 = vld [vmem:[%s433_s5] sm:$0x1] }
  0x17   :  { %153 = vmatpush.bf16.msra.mxu1 %v236_v5 }
  0x1b   :  { %154 = vmatpush.bf16.msra.mxu1 %v235_v6 }
  0x1f   :  { %155 = vmatpush.bf16.msra.mxu1 %v234_v7 }
  0x87   :  { %v168_v24 = vpop.permute.xlu0 %167 }
  0x88   :  { %v170_v25 = vperm.slane %v168_v24, 0 }
  0x92   :  { %v102_v9 = vpop.f32.mrf.mxu0 }
  0x93   :  { %v103_v10 = vadd.f32 %v246_v8, %v102_v9 }
  0x95   :  { %248 = vtanh.f32 %v103_v10 }
  0x9a   :  { %v104_v11 = vpop.f32.mrf.mxu0 }
  0x9b   :  { %v249_v12 = vpop.eup %248 }
  0x9c   :  { %v107_v13 = vpack.c.bf16 %v249_v12, %v249_v12 }
  0x9e   :  { %231 = vmatmul.msk.bf16.vlgmr.msra.gmra.mxu1 %vm144_vm1, %v107_v13 }
 0x11b   :  { %v157_v17 = vpop.f32.mrf.mxu1 }
 0x11c   :  { %v158_v18 = vadd.f32 %v247_v16, %v157_v17 }
 0x11e   :  { %250 = vtanh.f32 %v158_v18 }
 0x123   :  { %v159_v19 = vpop.f32.mrf.mxu1 }
 0x124   :  { %v251_v20 = vpop.eup %250 }
 0x125   :  { %v163_v21 = vpack.c.bf16 %v251_v20, %v251_v20 }
 0x127   :  { %v175_v22 = vsel %vm144_vm1, %v163_v21, 0 }
 0x128   :  { %184 = vmatpush.bf16.xpose.msra.mxu2 %v175_v22 }
 0x12f   :  { %232 = vmatmul.msk.bf16.vlgmr.msra.gmra.mxu2 %vm144_vm1, %v162_v23 }
 0x1b2   :  { %v186_v26 = vpop.f32.mrf.mxu2 }
 0x1b3   :  { %v187_v27 = vadd.f32 %v186_v26, %v170_v25 }
 0x1b5   :  { %191 = vst.msk [vmem:[#allocation9] sm:$0x1] %vm190_vm2, %v187_v27 }
 0x1b6   :  { %202 = dma.vmem_to_hbm [thread:$0]  %s198_s22, 16, %s200_s24, [#allocation5]  }
 0x1ba   :  { %v188_v28 = vpop.f32.mrf.mxu2 }
 0x1bb   :  { %352 = dma.done.wait [#allocation5], 16  }
 0x1bc   :  { %353 = vsyncadd [#allocation5], 4294967280 }
 0x1bd   :  { %207 = vsyncpa [#allocation4], 1 }
 0x1be   :  { %208 = vsyncpa [#allocation7], 1 }
 0x1bf   :  { %209 = vsyncpa [#allocation5], 1 }

</bundles_post_ra>
